<compile_context>
chip_gen: v7x
topology: tpu7x:2x2x1
jax: 0.10.0
libtpu: 0.0.40
codegen_flags: <defaults>
</compile_context>

<pallas_src>
import jax
import jax.numpy as jnp
from jax.experimental import pallas as pl
from jax.experimental.pallas import tpu as pltpu


def outconv3d_kernel(x_ref, w_ref, b_ref, o_ref):
    # x_ref: (1, K, TP)    im2col columns for one batch element / spatial tile
    # w_ref: (Cout, K)     fused conv weight, K = 27 * Cin  (resident, const map)
    # b_ref: (Cout, 1)     bias
    # o_ref: (1, Cout, TP) lane-dense output slab
    o_ref[0] = (
        jnp.dot(w_ref[...], x_ref[0], preferred_element_type=jnp.float32)
        + b_ref[...]
    ).astype(o_ref.dtype)


def _pick_spatial_tile(p, cap=8192):
    """Largest lane-dense (multiple of 128) tile dividing p, capped for VMEM."""
    for t in (8192, 4096, 2048, 1024, 512, 256, 128):
        if t <= cap and p % t == 0:
            return t
    return p  # fallback: full extent (legal full-dim block)


@jax.jit
def out_conv(x_ncdhw, weight, bias):
    """Forward of OutConv. x_ncdhw: (N, Cin, D, H, W); weight: (Cout, Cin, 3, 3, 3)."""
    N, Cin, D, H, W = x_ncdhw.shape
    Cout = weight.shape[0]
    P = D * H * W
    K = 27 * Cin

    # --- wrapper-side layout plumbing (im2col, channels-first tap order) ----
    xp = jnp.pad(x_ncdhw, ((0, 0), (0, 0), (1, 1), (1, 1), (1, 1)))
    taps = []
    for kd in range(3):
        for kh in range(3):
            for kw in range(3):
                taps.append(xp[:, :, kd:kd + D, kh:kh + H, kw:kw + W])
    # (N, Cin, 27, D, H, W) -> (N, K, P); K index = ci*27 + kd*9 + kh*3 + kw
    im2col = jnp.stack(taps, axis=2).reshape(N, K, P)

    # weight (Cout, Cin, 3, 3, 3) -> (Cout, K) with the same K ordering.
    w_mat = weight.reshape(Cout, K)
    b_col = bias.reshape(Cout, 1)

    TP = _pick_spatial_tile(P)
    grid = (N, P // TP)

    out_flat = pl.pallas_call(
        outconv3d_kernel,
        out_shape=jax.ShapeDtypeStruct((N, Cout, P), x_ncdhw.dtype),
        grid_spec=pltpu.PrefetchScalarGridSpec(
            num_scalar_prefetch=0,
            grid=grid,
            in_specs=[
                pl.BlockSpec((1, K, TP), lambda n, p: (n, 0, p)),
                pl.BlockSpec((Cout, K), lambda n, p: (0, 0)),
                pl.BlockSpec((Cout, 1), lambda n, p: (0, 0)),
            ],
            out_specs=pl.BlockSpec((1, Cout, TP), lambda n, p: (n, 0, p)),
        ),
        compiler_params=pltpu.CompilerParams(
            dimension_semantics=("parallel", "parallel")),
    )(im2col, w_mat, b_col)

    # (N, Cout, P) -> (N, Cout, D, H, W): already NCDHW, no transpose needed.
    return out_flat.reshape(N, Cout, D, H, W)


def reference_conv3d(x_ncdhw, weight, bias):
    """Pure-JAX reference (lax conv) matching nn.Conv3d(k=3, padding=1)."""
    out = jax.lax.conv_general_dilated(
        x_ncdhw, weight,
        window_strides=(1, 1, 1),
        padding=((1, 1), (1, 1), (1, 1)),
        dimension_numbers=("NCDHW", "OIDHW", "NCDHW"),
    )
    return out + bias.reshape(1, -1, 1, 1, 1)


if __name__ == "__main__":
    # Module config: OutConv(in_size=4, out_size=3)
    N, Cin, Cout = 2, 4, 3
    D = H = W = 8

    key = jax.random.PRNGKey(0)
    kx, kw, kb = jax.random.split(key, 3)

    x = jax.random.normal(kx, (N, Cin, D, H, W), dtype=jnp.float32)
    # Deterministic parameter init (shapes from nn.Conv3d(Cin, Cout, 3)).
    fan_in = Cin * 3 * 3 * 3
    bound = 1.0 / (fan_in ** 0.5)
    weight = jax.random.uniform(kw, (Cout, Cin, 3, 3, 3), jnp.float32,
                                minval=-bound, maxval=bound)
    bias = jax.random.uniform(kb, (Cout,), jnp.float32,
                              minval=-bound, maxval=bound)

    out = out_conv(x, weight, bias)
    out = jax.block_until_ready(out)

    ref = jax.block_until_ready(reference_conv3d(x, weight, bias))
    assert out.shape == (N, Cout, D, H, W), out.shape
    assert jnp.allclose(out, ref, atol=1e-4, rtol=1e-4), \
        float(jnp.max(jnp.abs(out - ref)))

    print("KERNEL_OK")
</pallas_src>

<mosaic_0001>
module attributes {stable_mosaic.version = 11 : i64} {
  func.func @outconv3d_kernel(%arg0: i32, %arg1: i32, %arg2: memref<1x108x512xf32, #tpu.memory_space<vmem>>, %arg3: memref<3x108xf32, #tpu.memory_space<vmem>>, %arg4: memref<3x1xf32, #tpu.memory_space<vmem>>, %arg5: memref<1x3x512xf32, #tpu.memory_space<vmem>>) attributes {dimension_semantics = [#tpu.dimension_semantics<parallel>, #tpu.dimension_semantics<parallel>], iteration_bounds = array<i64: 2, 1>, scalar_prefetch = 0 : i64, scratch_operands = 0 : i64, tpu.core_type = #tpu.core_type<tc>, window_params = [{transform_indices = @transform_0, window_bounds = array<i64: 1, 108, 512>}, {pipeline_mode = #tpu.pipeline_mode<synchronous>, transform_indices = @transform_1, window_bounds = array<i64: 3, 108>}, {pipeline_mode = #tpu.pipeline_mode<synchronous>, transform_indices = @transform_2, window_bounds = array<i64: 3, 1>}, {transform_indices = @transform_3, window_bounds = array<i64: 1, 3, 512>}]} {
    %c0 = arith.constant 0 : index
    %c0_0 = arith.constant 0 : index
    %0 = vector.load %arg3[%c0, %c0_0] : memref<3x108xf32, #tpu.memory_space<vmem>>, vector<3x108xf32>
    %c0_1 = arith.constant 0 : index
    %c0_2 = arith.constant 0 : index
    %c0_3 = arith.constant 0 : index
    %1 = vector.load %arg2[%c0_1, %c0_2, %c0_3] : memref<1x108x512xf32, #tpu.memory_space<vmem>>, vector<1x108x512xf32>
    %2 = vector.shape_cast %1 : vector<1x108x512xf32> to vector<108x512xf32>
    %cst = arith.constant dense<0.000000e+00> : vector<3x512xf32>
    %3 = tpu.matmul %0, %2, %cst {dimension_numbers = #tpu.dot_dimension_numbers<[1], [0], [0], [1], [0, 0, 1, 1], [], []>} : vector<3x108xf32>, vector<108x512xf32>, vector<3x512xf32> -> vector<3x512xf32>
    %c0_4 = arith.constant 0 : index
    %c0_5 = arith.constant 0 : index
    %4 = vector.load %arg4[%c0_4, %c0_5] : memref<3x1xf32, #tpu.memory_space<vmem>>, vector<3x1xf32>
    %5 = vector.broadcast %4 : vector<3x1xf32> to vector<3x512xf32>
    %6 = arith.addf %3, %5 : vector<3x512xf32>
    %c0_6 = arith.constant 0 : index
    %c0_7 = arith.constant 0 : index
    %c0_8 = arith.constant 0 : index
    %7 = vector.load %arg5[%c0_6, %c0_7, %c0_8] : memref<1x3x512xf32, #tpu.memory_space<vmem>>, vector<1x3x512xf32>
    %8 = vector.shape_cast %7 : vector<1x3x512xf32> to vector<3x512xf32>
    %9 = vector.shape_cast %6 : vector<3x512xf32> to vector<1x3x512xf32>
    tpu.vector_store %arg5[%c0_6, %c0_7, %c0_8], %9 {strides = array<i32>} : memref<1x3x512xf32, #tpu.memory_space<vmem>>, vector<1x3x512xf32>,
    return
  }
  func.func @transform_0(%arg0: i32, %arg1: i32) -> (i32, i32, i32) {
    %c0_i32 = arith.constant 0 : i32
    %c0_i32_0 = arith.constant 0 : i32
    return %arg0, %c0_i32, %arg1 : i32, i32, i32
  }
  func.func @transform_1(%arg0: i32, %arg1: i32) -> (i32, i32) {
    %c0_i32 = arith.constant 0 : i32
    %c0_i32_0 = arith.constant 0 : i32
    %c0_i32_1 = arith.constant 0 : i32
    return %c0_i32, %c0_i32_0 : i32, i32
  }
  func.func @transform_2(%arg0: i32, %arg1: i32) -> (i32, i32) {
    %c0_i32 = arith.constant 0 : i32
    %c0_i32_0 = arith.constant 0 : i32
    %c0_i32_1 = arith.constant 0 : i32
    return %c0_i32, %c0_i32_0 : i32, i32
  }
  func.func @transform_3(%arg0: i32, %arg1: i32) -> (i32, i32, i32) {
    %c0_i32 = arith.constant 0 : i32
    %c0_i32_0 = arith.constant 0 : i32
    return %arg0, %c0_i32, %arg1 : i32, i32, i32
  }
}

</mosaic_0001>

<bundles_post_ra>
// kernel: out_conv.1
= control target key start
LH: loop header
LB: loop body
LE: loop exit
PB: predicated region body
PF: predicated region fallthrough
CT: control target
= control target key end

     0   :  { %s682_s12 = smov 0   ;;  %s684_s13 = smov 0   ;;  %s783_s0 = inlined_call_operand.vmem [shape: f32[2,108,512], index: 0, kind: input, shape index: {}]   ;;  %s784_s1 = inlined_call_operand.vmem [shape: f32[3,108], index: 1, kind: input, shape index: {}]   ;;  %s785_s2 = inlined_call_operand.vmem [shape: f32[3,1], index: 2, kind: input, shape index: {}]   ;;  %s786_s3 = inlined_call_operand.vmem [shape: f32[2,3,512], index: 3, kind: output, shape index: {}]  }
   0x1   :  { %s686_s14 = smov 0  }
   0x2 LB: > { %s25_s15 = sadd.s32 1, %s653_s13  ;;  %p533_p0 = scmp.ge.s32.totalorder %s657_s14, 1  ;;  %s657_s14 = sphi %s686_s14, %s13_s14   ;;  %s653_s13 = sphi %s684_s13, %s788_s13   ;;  %s649_s12 = sphi %s682_s12, %s787_s12  }
   0x3   : > { %p27_p1 = scmp.ge.s32.totalorder %s25_s15, 2  ;;  %p158_p2 = scmp.lt.s32.totalorder %s657_s14, 3 }
   0x5   : > { %s790_s15 = smov (%p27_p1, %s25_s15), 0  ;;  %p159_p3 = pnand %p533_p0, %p158_p2 }
   0x6   : > { %p191_p4 = scmp.lt.s32.totalorder (!%p159_p3), %s649_s12, 1  ;;  %v659_v0 = vmov (!%p159_p3), 0.0   ;;  %v267_v1 = vld [vmem:[%s785_s2] sm:$0x7] (!%p159_p3)  ;;  %v660_v2 = vmov (!%p159_p3), 0   ;;  %vm277_vm0 = vcmask (!%p159_p3), 1043456  }
   0x7   : > { %162 = sbr.rel (%p159_p3) target bundleno = 269 (0x10d), region = 32  ;;  %354 = vmatprep.mubr.f32.mxu0 (!%p159_p3), %v659_v0  ;;  %425 = vmatprep.mubr.f32.mxu1 (!%p159_p3), %v659_v0  ;;  %vm661_vm1 = vmmov (!%p159_p3), 1   ;;  %vm273_vm3 = vcmask (!%p159_p3), 883712  }
   0x8   : > { %634 = vset.pattern.permute.xlu0 (!%p159_p3), %v660_v2  ;;  %vm571_vm2 = vmpackc.low (!%p159_p3), %vm277_vm0, %vm661_vm1 }
   0x9   : > { %270 = vperm.xlu0 (!%p159_p3), %634, %v267_v1  }
   0xe   : > { %s792_s12 = smov (!%p191_p4, %s649_s12), 1 }
   0xf   : > { %s606_s18 = smul.u32 448, %s792_s12  ;;  %s545_s24 = sshll.u32 %s792_s12, 4 }
  0x10   : > { %s208_s27 = scalar_lea.vmem %s786_s3, %s545_s24 }
  0x11   : > { %s709_s21 = scalar_lea.vmem %s783_s0, %s606_s18 }
  0x12   : > { %v212_v3 = vld [vmem:[%s709_s21 + $0x8] sm:$0xff]  ;;  %v214_v5 = vld [vmem:[%s709_s21 + $0x18] sm:$0xff]  ;;  %v211_v8 = vld [vmem:[%s709_s21] sm:$0xff] }
  0x13   : > { %v216_v4 = vld [vmem:[%s709_s21 + $0x28] sm:$0xff]  ;;  %v218_v7 = vld [vmem:[%s709_s21 + $0x38] sm:$0xff]  ;;  %v215_v9 = vld [vmem:[%s709_s21 + $0x20] sm:$0xff] }
  0x14   : > { %v546_v6 = vpack.c.bf16 %v216_v4, %v212_v3  ;;  %v576_v10 = vpack.c.bf16 %v218_v7, %v214_v5  ;;  %v548_v11 = vpack.c.bf16 %v215_v9, %v211_v8  ;;  %v213_v12 = vld [vmem:[%s709_s21 + $0x10] sm:$0xff]  ;;  %v220_v14 = vld [vmem:[%s709_s21 + $0x48] sm:$0xff]  ;;  %v222_v17 = vld [vmem:[%s709_s21 + $0x58] sm:$0xff] }
  0x15   : > { %v217_v13 = vld [vmem:[%s709_s21 + $0x30] sm:$0xff]  ;;  %v224_v16 = vld [vmem:[%s709_s21 + $0x68] sm:$0xff]  ;;  %v226_v18 = vld [vmem:[%s709_s21 + $0x78] sm:$0xff] }
  0x16   : > { %547 = vmatprep.subr.bf16.mxu0 %v546_v6  ;;  %v578_v15 = vpack.c.bf16 %v217_v13, %v213_v12  ;;  %577 = vmatprep.subr.bf16.mxu1 %v576_v10  ;;  %v550_v19 = vpack.c.bf16 %v224_v16, %v220_v14  ;;  %v580_v20 = vpack.c.bf16 %v226_v18, %v222_v17  ;;  %v219_v21 = vld [vmem:[%s709_s21 + $0x40] sm:$0xff]  ;;  %v221_v23 = vld [vmem:[%s709_s21 + $0x50] sm:$0xff]  ;;  %v228_v26 = vld [vmem:[%s709_s21 + $0x88] sm:$0xff] }
  0x17   : > { %549 = vmatpush1.bf16.msra.mxu0 %v548_v11  ;;  %v223_v22 = vld [vmem:[%s709_s21 + $0x60] sm:$0xff]  ;;  %v225_v25 = vld [vmem:[%s709_s21 + $0x70] sm:$0xff]  ;;  %v232_v27 = vld [vmem:[%s709_s21 + $0xa8] sm:$0xff] }
  0x18   : > { %579 = vmatpush1.bf16.msra.mxu1 %v578_v15  ;;  %v552_v24 = vpack.c.bf16 %v223_v22, %v219_v21  ;;  %551 = vmatprep.subr.bf16.mxu0 %v550_v19  ;;  %v582_v28 = vpack.c.bf16 %v225_v25, %v221_v23  ;;  %v554_v29 = vpack.c.bf16 %v232_v27, %v228_v26  ;;  %v230_v30 = vld [vmem:[%s709_s21 + $0x98] sm:$0xff]  ;;  %v227_v32 = vld [vmem:[%s709_s21 + $0x80] sm:$0xff]  ;;  %v229_v35 = vld [vmem:[%s709_s21 + $0x90] sm:$0xff] }
  0x19   : > { %581 = vmatprep.subr.bf16.mxu1 %v580_v20  ;;  %v234_v31 = vld [vmem:[%s709_s21 + $0xb8] sm:$0xff]  ;;  %v231_v34 = vld [vmem:[%s709_s21 + $0xa0] sm:$0xff]  ;;  %v233_v36 = vld [vmem:[%s709_s21 + $0xb0] sm:$0xff] }
  0x1a   : > { %v584_v33 = vpack.c.bf16 %v234_v31, %v230_v30  ;;  %v556_v37 = vpack.c.bf16 %v231_v34, %v227_v32  ;;  %v236_v38 = vld [vmem:[%s709_s21 + $0xc8] sm:$0xff]  ;;  %v238_v40 = vld [vmem:[%s709_s21 + $0xd8] sm:$0xff]  ;;  %v586_v41 = vpack.c.bf16 %v233_v36, %v229_v35  ;;  %v235_v44 = vld [vmem:[%s709_s21 + $0xc0] sm:$0xff] }
  0x1b   : > { %553 = vmatpush1.bf16.msra.mxu0 %v552_v24  ;;  %v240_v39 = vld [vmem:[%s709_s21 + $0xe8] sm:$0xff]  ;;  %v242_v43 = vld [vmem:[%s709_s21 + $0xf8] sm:$0xff]  ;;  %v239_v45 = vld [vmem:[%s709_s21 + $0xe0] sm:$0xff] }
  0x1c   : > { %583 = vmatpush1.bf16.msra.mxu1 %v582_v28  ;;  %555 = vmatprep.subr.bf16.mxu0 %v554_v29  ;;  %v558_v42 = vpack.c.bf16 %v240_v39, %v236_v38  ;;  %v588_v46 = vpack.c.bf16 %v242_v43, %v238_v40  ;;  %v237_v47 = vld [vmem:[%s709_s21 + $0xd0] sm:$0xff]  ;;  %v244_v49 = vld [vmem:[%s709_s21 + $0x108] sm:$0xff]  ;;  %v246_v51 = vld [vmem:[%s709_s21 + $0x118] sm:$0xff]  ;;  %v560_v53 = vpack.c.bf16 %v239_v45, %v235_v44 }
  0x1d   : > { %585 = vmatprep.subr.bf16.mxu1 %v584_v33  ;;  %v241_v48 = vld [vmem:[%s709_s21 + $0xf0] sm:$0xff]  ;;  %v248_v50 = vld [vmem:[%s709_s21 + $0x128] sm:$0xff]  ;;  %v250_v52 = vld [vmem:[%s709_s21 + $0x138] sm:$0xff] }
  0x1e   : > { %v590_v54 = vpack.c.bf16 %v241_v48, %v237_v47  ;;  %v562_v55 = vpack.c.bf16 %v248_v50, %v244_v49  ;;  %v243_v56 = vld [vmem:[%s709_s21 + $0x100] sm:$0xff]  ;;  %v245_v58 = vld [vmem:[%s709_s21 + $0x110] sm:$0xff]  ;;  %v592_v59 = vpack.c.bf16 %v250_v52, %v246_v51  ;;  %v252_v61 = vld [vmem:[%s709_s21 + $0x148] sm:$0xff] }
  0x1f   : > { %557 = vmatpush1.bf16.msra.mxu0 %v556_v37  ;;  %v247_v57 = vld [vmem:[%s709_s21 + $0x120] sm:$0xff]  ;;  %v249_v60 = vld [vmem:[%s709_s21 + $0x130] sm:$0xff]  ;;  %v256_v62 = vld [vmem:[%s709_s21 + $0x168] sm:$0xff] }
  0x20   : > { %587 = vmatpush1.bf16.msra.mxu1 %v586_v41  ;;  %559 = vmatprep.subr.bf16.mxu0 %v558_v42  ;;  %v254_v63 = vld [vmem:[%s709_s21 + $0x158] sm:$0xff]  ;;  %v564_v1 = vpack.c.bf16 %v247_v57, %v243_v56  ;;  %v594_v2 = vpack.c.bf16 %v249_v60, %v245_v58  ;;  %v566_v3 = vpack.c.bf16 %v256_v62, %v252_v61  ;;  %v251_v4 = vld [vmem:[%s709_s21 + $0x140] sm:$0xff]  ;;  %v253_v6 = vld [vmem:[%s709_s21 + $0x150] sm:$0xff] }
  0x21   : > { %589 = vmatprep.subr.bf16.mxu1 %v588_v46  ;;  %v258_v0 = vld [vmem:[%s709_s21 + $0x178] sm:$0xff]  ;;  %v255_v5 = vld [vmem:[%s709_s21 + $0x160] sm:$0xff]  ;;  %v257_v8 = vld [vmem:[%s709_s21 + $0x170] sm:$0xff] }
  0x22   : > { %v596_v7 = vpack.c.bf16 %v258_v0, %v254_v63  ;;  %v260_v9 = vld [vmem:[%s709_s21 + $0x188] sm:$0xff]  ;;  %v262_v11 = vld [vmem:[%s709_s21 + $0x198] sm:$0xff]  ;;  %v568_v13 = vpack.c.bf16 %v255_v5, %v251_v4  ;;  %v598_v14 = vpack.c.bf16 %v257_v8, %v253_v6  ;;  %v259_v16 = vld [vmem:[%s709_s21 + $0x180] sm:$0xff] }
  0x23   : > { %561 = vmatpush1.bf16.msra.mxu0 %v560_v53  ;;  %v264_v10 = vld [vmem:[%s709_s21 + $0x1a8] sm:$0xf]  ;;  %v266_v12 = vld [vmem:[%s709_s21 + $0x1b8] sm:$0xf]  ;;  %v263_v17 = vld [vmem:[%s709_s21 + $0x1a0] sm:$0xf] }
  0x24   : > { %591 = vmatpush1.bf16.msra.mxu1 %v590_v54  ;;  %563 = vmatprep.subr.bf16.mxu0 %v562_v55  ;;  %v570_v15 = vpack.c.bf16 %v264_v10, %v260_v9  ;;  %v600_v18 = vpack.c.bf16 %v266_v12, %v262_v11  ;;  %v261_v19 = vld [vmem:[%s709_s21 + $0x190] sm:$0xff]  ;;  %v573_v21 = vpack.c.bf16 %v263_v17, %v259_v16  ;;  %v210_v23 = vld [vmem:[%s784_s1] sm:$0x7] }
  0x25   : > { %593 = vmatprep.subr.bf16.mxu1 %v592_v59  ;;  %v265_v20 = vld [vmem:[%s709_s21 + $0x1b0] sm:$0xf] }
  0x26   : > { %v603_v22 = vpack.c.bf16 %v265_v20, %v261_v19 }
  0x27   : > { %565 = vmatpush1.bf16.msra.mxu0 %v564_v1 }
  0x28   : > { %595 = vmatpush1.bf16.msra.mxu1 %v594_v2  ;;  %567 = vmatprep.subr.bf16.mxu0 %v566_v3 }
  0x29   : > { %597 = vmatprep.subr.bf16.mxu1 %v596_v7 }
  0x2b   : > { %569 = vmatpush1.bf16.msra.mxu0 %v568_v13 }
  0x2c   : > { %599 = vmatpush1.bf16.msra.mxu1 %v598_v14  ;;  %572 = vmatprep.subr.msk.bf16.mxu0 %vm571_vm2, %v570_v15 }
  0x2d   : > { %602 = vmatprep.subr.msk.bf16.mxu1 %vm571_vm2, %v600_v18 }
  0x2f   : > { %575 = vmatpush1.bf16.msk.msra.mxu0 %vm571_vm2, %v573_v21 }
  0x30   : > { %605 = vmatpush1.bf16.msk.msra.mxu1 %vm571_vm2, %v603_v22 }
  0x32   : > { %539 = vmatmul.mubr.msk.f32.vlgmr.msra.gmra.mrb[0].mxu0 %vm273_vm3, %v210_v23 }
  0x33   : > { %542 = vmatmul.mubr.msk.f32.vlgmr.msra.gmra.mrb[0].mxu1 %vm273_vm3, %v210_v23 }
  0x88   : > { %v271_v24 = vpop.permute.xlu0 %270 }
 0x105   : > { %v356_v25 = vpop.f32.mrb[0].mxu0 }
 0x106   : > { %v357_v26 = vadd.f32 %v356_v25, %v271_v24  ;;  %v427_v27 = vpop.f32.mrb[0].mxu1  ;;  %v358_v28 = vpop.f32.mrb[1].mxu0 }
 0x107   : > { %v428_v29 = vadd.f32 %v427_v27, %v271_v24  ;;  %v359_v30 = vadd.f32 %v358_v28, %v271_v24  ;;  %v429_v31 = vpop.f32.mrb[1].mxu1 }
 0x108   : > { %v430_v32 = vadd.f32 %v429_v31, %v271_v24 }
 0x109   : > { %v436_v33 = vcombine.low %v357_v26, %v359_v30 }
 0x10a   : > { %v437_v34 = vcombine.low %v428_v29, %v430_v32 }
 0x10b   : > { %440 = vst [vmem:[%s208_s27] sm:$0x77] %v436_v33 }
 0x10c   : > { %441 = vst [vmem:[%s208_s27 + $0x8] sm:$0x77] %v437_v34 }
 0x10d PF: > { %s13_s14 = sadd.s32 1, %s657_s14   ;;  %s787_s12 = smov %s653_s13 }
 0x10e   : > { %p10_p5 = scmp.ge.s32.totalorder %s13_s14, 4   ;;  %s788_s13 = smov %s790_s15 }
 0x110   :  { %12 = sbr.rel (!%p10_p5) target bundleno = 2 (0x2), region = 62 }

</bundles_post_ra>
